<compile_context>
chip_gen: v6e
topology: v6e:2x2x1
jax: 0.10.0
libtpu: 0.0.40
codegen_flags: <defaults>
</compile_context>

<pallas_src>
import functools

import jax
import jax.numpy as jnp
from jax.experimental import pallas as pl
from jax.experimental.pallas import tpu as pltpu

GEM_P = 3.0       # radenovic GeM default power (hard-wired as a cube below)
GEM_EPS = 1e-6    # clamp eps in GeM
L2_EPS = 1e-6     # eps in L2N normalization


# ---------------------------------------------------------------------------
# Fused kernel: GeM(p=3) -> L2N -> Linear(C->D)+bias -> L2N.
# Grid = (batch_groups, hw_tiles); spatial reduction tiled along the inner axis.
#   x_ref  : (TN, t_hw, C) feature tile (channels on lanes), any float dtype
#   w_ref  : (C, D)        whitening weight, bf16, VMEM-resident (const index_map)
#   b_ref  : (1, D)        whitening bias (f32)
#   o_ref  : (TN, D)       output descriptor rows (f32)
#   acc_ref: (TN, 8, C) f32 running partial sums of clamp(x)^3 over HW tiles
# ---------------------------------------------------------------------------
def _gem_whiten_kernel(x_ref, w_ref, b_ref, o_ref, acc_ref, *, inv_hw):
    s = pl.program_id(1)

    @pl.when(s == 0)
    def _init():
        acc_ref[...] = jnp.zeros_like(acc_ref)

    x = x_ref[...].astype(jnp.float32)                 # (TN, t_hw, C)
    xc = jnp.maximum(x, GEM_EPS)                       # clamp(min=eps)
    cube = xc * xc * xc                                # p=3 power on the VALU
    tn, t_hw, c = cube.shape
    if t_hw % 8 == 0:
        # Pure vreg adds into the (TN, 8, C) accumulator; no per-tile XLU reduce.
        acc_ref[...] += cube.reshape(tn, t_hw // 8, 8, c).sum(axis=1)
    else:
        # Fallback (full-extent tile with H*W not a multiple of 8, e.g. 7x7 maps).
        acc_ref[:, 0:1, :] += jnp.sum(cube, axis=1, keepdims=True)

    @pl.when(s == pl.num_programs(1) - 1)
    def _finalize():
        # Single sublane (XLU) reduce: (TN, 8, C) -> (TN, C).
        pooled_sum = jnp.sum(acc_ref[...], axis=1)
        # GeM: (mean of x^p)^(1/p).  Only (TN, C) elements hit the EUP pow.
        pooled = (pooled_sum * inv_hw) ** (1.0 / GEM_P)                   # (TN, C)
        # L2N over channels (exact reciprocal: finalize-only, costs nothing).
        nrm = jnp.sqrt(jnp.sum(pooled * pooled, axis=-1, keepdims=True))  # (TN, 1)
        v = pooled / (nrm + L2_EPS)                                       # (TN, C)
        # Whitening FC: bf16 x bf16 MXU matmul with f32 accumulation.
        y = jnp.dot(v.astype(w_ref.dtype), w_ref[...],
                    preferred_element_type=jnp.float32)                   # (TN, D)
        y = y + b_ref[...].astype(jnp.float32)
        # L2N over the descriptor dim (exact).
        nrm_y = jnp.sqrt(jnp.sum(y * y, axis=-1, keepdims=True))          # (TN, 1)
        o_ref[...] = (y / (nrm_y + L2_EPS)).astype(o_ref.dtype)


def _vmem_capacity_bytes():
    """Per-TensorCore VMEM capacity (v5e/v6e: 128 MiB, v7x: 64 MiB)."""
    try:
        info = pltpu.get_tpu_info()
        cap = getattr(info, "vmem_capacity_bytes", None)
        if cap:
            return int(cap)
    except Exception:
        pass
    return 64 * 1024 * 1024      # conservative fallback (v7x per-TC size)


def _pick_spatial_block(hw, per_pos_bytes, budget_bytes):
    """Largest spatial tile (multiple of 8 dividing hw, or hw itself) within budget."""
    if hw * per_pos_bytes <= budget_bytes:
        return hw
    best = None
    t = 8
    while t <= hw:
        if hw % t == 0 and t * per_pos_bytes <= budget_bytes:
            best = t
        t += 8
    if best is not None:
        return best
    # No multiple-of-8 divisor fits; full extent is the only layout-legal
    # fallback (second-to-last block dim must be 8-aligned or the full dim).
    # vmem_limit below is sized from the actual choice, so this degrades
    # gracefully instead of failing to compile.
    return hw


def _pick_row_block(n, cap=128):
    """Row batch TN: full batch if it fits the MXU cap, else the largest
    8-multiple divisor (1 as last resort).  128 is safe on all generations."""
    if n <= cap:
        return n
    best = 1
    t = 8
    while t <= cap:
        if n % t == 0:
            best = t
        t += 8
    return best


def _const_spec(shape, index_map, nbytes):
    """BlockSpec for a grid-invariant operand.  Large ones are single-buffered
    (default double-buffering of a never-changing block only wastes VMEM:
    2 x C*D*2B = 16 MiB at C=D=2048 -- 25% of v7x's 64 MiB)."""
    if nbytes >= (4 << 20) and hasattr(pl, "Buffered"):
        return pl.BlockSpec(shape, index_map, pipeline_mode=pl.Buffered(1))
    return pl.BlockSpec(shape, index_map)


# ---------------------------------------------------------------------------
# Full forward of the descriptor head (GeM -> L2 -> whiten -> L2 -> permute).
#   feats_nhwc  : (N, H, W, C) backbone feature map, channels-last (bf16 ideal;
#                 the (N, HW, C) view below is free -- no transpose pass).
#   whiten_w_cd : (C, D) Linear weight, pre-transposed from PyTorch's (D, C)
#                 and ideally already bf16 (one-time model-load prep).
#   whiten_b    : (D,) Linear bias
# Returns (D, N) to match the PyTorch .permute(1, 0).
# ---------------------------------------------------------------------------
def global_descriptor_forward(feats_nhwc, whiten_w_cd, whiten_b, *,
                              spatial_block=None, row_block=None):
    n, h, w, c = feats_nhwc.shape
    hw = h * w
    assert whiten_w_cd.shape[0] == c, "weight must be (C, D)"
    d = whiten_w_cd.shape[1]

    x = feats_nhwc.reshape(n, hw, c)                  # free view, channels on lanes
    w_cd = whiten_w_cd.astype(jnp.bfloat16)           # no-op when caller passes bf16
    b = whiten_b.reshape(1, d).astype(jnp.float32)

    tn_rows = _pick_row_block(n) if row_block is None else row_block
    assert n % tn_rows == 0, "row_block must divide N"

    cap = _vmem_capacity_bytes()
    itemsize = x.dtype.itemsize
    w_bytes = c * d * 2
    w_bufs = 1 if (w_bytes >= (4 << 20) and hasattr(pl, "Buffered")) else 2
    resident = (w_bufs * w_bytes                    # whitening weight (bf16)
                + 2 * d * 4                         # bias
                + tn_rows * 8 * c * 4               # f32 accumulator scratch
                + 2 * tn_rows * d * 4)              # double-buffered output block

    if spatial_block is None:
        # Generation-aware tile budget: ~8 MiB on v7x (64 MiB VMEM),
        # ~16 MiB on v5e/v6e (128 MiB), bounded by what's left after residents.
        budget = max(1 << 20,
                     min(cap // 8, (int(cap * 0.85) - resident) // 2))
        spatial_block = _pick_spatial_block(hw, tn_rows * c * itemsize, budget)
    assert hw % spatial_block == 0, "spatial_block must divide H*W"
    assert spatial_block % 8 == 0 or spatial_block == hw
    n_hw_tiles = hw // spatial_block

    tile_bytes = tn_rows * spatial_block * c * itemsize
    est = resident + 2 * tile_bytes + (2 << 20)
    vmem_limit = int(min(max(est, 32 * 1024 * 1024), int(cap * 0.9)))

    kernel = functools.partial(_gem_whiten_kernel, inv_hw=1.0 / hw)
    out_nd = pl.pallas_call(
        kernel,
        out_shape=jax.ShapeDtypeStruct((n, d), jnp.float32),
        grid_spec=pltpu.PrefetchScalarGridSpec(
            num_scalar_prefetch=0,
            grid=(n // tn_rows, n_hw_tiles),
            in_specs=[
                pl.BlockSpec((tn_rows, spatial_block, c), lambda i, s: (i, s, 0)),
                _const_spec((c, d), lambda i, s: (0, 0), w_bytes),     # weight resident
                _const_spec((1, d), lambda i, s: (0, 0), d * 4),       # bias resident
            ],
            out_specs=pl.BlockSpec((tn_rows, d), lambda i, s: (i, 0)),
            scratch_shapes=[pltpu.VMEM((tn_rows, 8, c), jnp.float32)],
        ),
        compiler_params=pltpu.CompilerParams(
            dimension_semantics=("parallel", "arbitrary"),
            vmem_limit_bytes=vmem_limit),
    )(x, w_cd, b)
    return out_nd.T                                                    # (D, N)


# ---------------------------------------------------------------------------
# Plain-JAX f32 reference (radenovic GeM + L2N + whitening + L2N + permute),
# taking the same NHWC features and the PyTorch-layout (D, C) f32 weight.
# ---------------------------------------------------------------------------
def reference_forward(feats_nhwc, whiten_w_dc, whiten_b):
    x = feats_nhwc.astype(jnp.float32)
    xc = jnp.maximum(x, GEM_EPS)
    pooled = jnp.mean(xc ** GEM_P, axis=(1, 2)) ** (1.0 / GEM_P)          # (N, C)
    pooled = pooled / (jnp.linalg.norm(pooled, axis=-1, keepdims=True) + L2_EPS)
    y = pooled @ whiten_w_dc.T.astype(jnp.float32) + whiten_b             # (N, D)
    y = y / (jnp.linalg.norm(y, axis=-1, keepdims=True) + L2_EPS)
    return y.T                                                            # (D, N)


if __name__ == "__main__":
    key = jax.random.PRNGKey(0)
    k_feat, k_w, k_b = jax.random.split(key, 3)

    # Small synthetic shapes (real model: C=2048 conv5 channels, D=2048 fc dim).
    N, H, W, C = 2, 16, 16, 128     # backbone feature map, channels-last
    D = 256                         # whitening fc output dim

    # Backbone features arrive channels-last and bf16 (half the DMA volume of
    # the dominant tensor); the kernel upcasts and accumulates in f32.
    feats = jax.random.normal(k_feat, (N, H, W, C), dtype=jnp.float32
                              ).astype(jnp.bfloat16)
    whiten_w = jax.random.normal(k_w, (D, C), dtype=jnp.float32) * 0.02   # PyTorch (D,C)
    whiten_b = jax.random.normal(k_b, (D,), dtype=jnp.float32) * 0.01

    # One-time model-load prep: (C, D) bf16 whitening weight (hoisted out of
    # the per-forward path).
    w_cd_bf16 = jnp.asarray(whiten_w.T, dtype=jnp.bfloat16)

    # spatial_block=128 forces 2 spatial tiles so the accumulator path is
    # exercised even at these small demo shapes (auto-pick would use 1 tile).
    fwd = jax.jit(functools.partial(global_descriptor_forward, spatial_block=128))
    out = jax.block_until_ready(fwd(feats, w_cd_bf16, whiten_b))

    ref = reference_forward(feats, whiten_w, whiten_b)
    assert out.shape == (D, N), out.shape
    max_err = float(jnp.max(jnp.abs(out - ref)))
    # bf16 weight/activation path -> slightly looser tolerance vs the f32 ref.
    assert jnp.allclose(out, ref, atol=5e-3, rtol=5e-2), f"max|err|={max_err}"

    print("KERNEL_OK")
</pallas_src>

<mosaic_0001>
module attributes {stable_mosaic.version = 11 : i64} {
  func.func @_gem_whiten_kernel(%arg0: i32, %arg1: i32, %arg2: memref<2x128x128xbf16, #tpu.memory_space<vmem>>, %arg3: memref<128x256xbf16, #tpu.memory_space<vmem>>, %arg4: memref<1x256xf32, #tpu.memory_space<vmem>>, %arg5: memref<2x256xf32, #tpu.memory_space<vmem>>, %arg6: memref<2x8x128xf32, #tpu.memory_space<vmem>>) attributes {dimension_semantics = [#tpu.dimension_semantics<parallel>, #tpu.dimension_semantics<arbitrary>], iteration_bounds = array<i64: 1, 2>, scalar_prefetch = 0 : i64, scratch_operands = 1 : i64, tpu.core_type = #tpu.core_type<tc>, window_params = [{transform_indices = @transform_0, window_bounds = array<i64: 2, 128, 128>}, {pipeline_mode = #tpu.pipeline_mode<synchronous>, transform_indices = @transform_1, window_bounds = array<i64: 128, 256>}, {pipeline_mode = #tpu.pipeline_mode<synchronous>, transform_indices = @transform_2, window_bounds = array<i64: 1, 256>}, {transform_indices = @transform_3, window_bounds = array<i64: 2, 256>}]} {
    %c0_i32 = arith.constant 0 : i32
    %0 = arith.cmpi eq, %arg1, %c0_i32 : i32
    %1 = arith.extui %0 : i1 to i32
    %c0_i32_0 = arith.constant 0 : i32
    %2 = arith.cmpi ne, %1, %c0_i32_0 : i32
    scf.if %2 {
      %cst_11 = arith.constant 0.000000e+00 : f32
      %17 = vector.broadcast %cst_11 : f32 to vector<2x8x128xf32>
      %c0_12 = arith.constant 0 : index
      %c0_13 = arith.constant 0 : index
      %c0_14 = arith.constant 0 : index
      %18 = vector.load %arg6[%c0_12, %c0_13, %c0_14] : memref<2x8x128xf32, #tpu.memory_space<vmem>>, vector<2x8x128xf32>
      tpu.vector_store %arg6[%c0_12, %c0_13, %c0_14], %17 {strides = array<i32>} : memref<2x8x128xf32, #tpu.memory_space<vmem>>, vector<2x8x128xf32>,
    } else {
    }
    %c0 = arith.constant 0 : index
    %c0_1 = arith.constant 0 : index
    %c0_2 = arith.constant 0 : index
    %3 = vector.load %arg2[%c0, %c0_1, %c0_2] : memref<2x128x128xbf16, #tpu.memory_space<vmem>>, vector<2x128x128xbf16>
    %4 = arith.extf %3 : vector<2x128x128xbf16> to vector<2x128x128xf32>
    %cst = arith.constant 9.99999997E-7 : f32
    %5 = vector.broadcast %cst : f32 to vector<2x128x128xf32>
    %6 = arith.maximumf %4, %5 : vector<2x128x128xf32>
    %7 = arith.mulf %6, %6 : vector<2x128x128xf32>
    %8 = arith.mulf %7, %6 : vector<2x128x128xf32>
    %c0_3 = arith.constant 0 : index
    %c0_4 = arith.constant 0 : index
    %c0_5 = arith.constant 0 : index
    %9 = vector.load %arg6[%c0_3, %c0_4, %c0_5] : memref<2x8x128xf32, #tpu.memory_space<vmem>>, vector<2x8x128xf32>
    %10 = vector.shape_cast %8 : vector<2x128x128xf32> to vector<2x16x8x128xf32>
    %cst_6 = arith.constant dense<0.000000e+00> : vector<2x8x128xf32>
    %11 = vector.multi_reduction <add>, %10, %cst_6 [1] : vector<2x16x8x128xf32> to vector<2x8x128xf32>
    %12 = arith.addf %9, %11 : vector<2x8x128xf32>
    %c0_7 = arith.constant 0 : index
    %c0_8 = arith.constant 0 : index
    %c0_9 = arith.constant 0 : index
    %13 = vector.load %arg6[%c0_7, %c0_8, %c0_9] : memref<2x8x128xf32, #tpu.memory_space<vmem>>, vector<2x8x128xf32>
    tpu.vector_store %arg6[%c0_7, %c0_8, %c0_9], %12 {strides = array<i32>} : memref<2x8x128xf32, #tpu.memory_space<vmem>>, vector<2x8x128xf32>,
    %c1_i32 = arith.constant 1 : i32
    %14 = arith.cmpi eq, %arg1, %c1_i32 : i32
    %15 = arith.extui %14 : i1 to i32
    %c0_i32_10 = arith.constant 0 : i32
    %16 = arith.cmpi ne, %15, %c0_i32_10 : i32
    scf.if %16 {
      %c0_11 = arith.constant 0 : index
      %c0_12 = arith.constant 0 : index
      %c0_13 = arith.constant 0 : index
      %17 = vector.load %arg6[%c0_11, %c0_12, %c0_13] : memref<2x8x128xf32, #tpu.memory_space<vmem>>, vector<2x8x128xf32>
      %cst_14 = arith.constant dense<0.000000e+00> : vector<2x128xf32>
      %18 = vector.multi_reduction <add>, %17, %cst_14 [1] : vector<2x8x128xf32> to vector<2x128xf32>
      %cst_15 = arith.constant 3.906250e-03 : f32
      %19 = vector.broadcast %cst_15 : f32 to vector<2x128xf32>
      %20 = arith.mulf %18, %19 : vector<2x128xf32>
      %cst_16 = arith.constant 0.333333343 : f32
      %21 = vector.broadcast %cst_16 : f32 to vector<2x128xf32>
      %22 = math.powf %20, %21 : vector<2x128xf32>
      %23 = arith.mulf %22, %22 : vector<2x128xf32>
      %cst_17 = arith.constant dense<0.000000e+00> : vector<2xf32>
      %24 = vector.multi_reduction <add>, %23, %cst_17 [1] : vector<2x128xf32> to vector<2xf32>
      %25 = vector.shape_cast %24 : vector<2xf32> to vector<2x1xf32>
      %26 = math.sqrt %25 : vector<2x1xf32>
      %cst_18 = arith.constant 9.99999997E-7 : f32
      %27 = vector.broadcast %cst_18 : f32 to vector<2x1xf32>
      %28 = arith.addf %26, %27 : vector<2x1xf32>
      %29 = vector.broadcast %28 : vector<2x1xf32> to vector<2x128xf32>
      %30 = arith.divf %22, %29 : vector<2x128xf32>
      %31 = arith.truncf %30 : vector<2x128xf32> to vector<2x128xbf16>
      %c0_19 = arith.constant 0 : index
      %c0_20 = arith.constant 0 : index
      %32 = vector.load %arg3[%c0_19, %c0_20] : memref<128x256xbf16, #tpu.memory_space<vmem>>, vector<128x256xbf16>
      %cst_21 = arith.constant dense<0.000000e+00> : vector<2x256xf32>
      %33 = tpu.matmul %31, %32, %cst_21 {dimension_numbers = #tpu.dot_dimension_numbers<[1], [0], [0], [1], [0, 0, 1, 1], [], []>} : vector<2x128xbf16>, vector<128x256xbf16>, vector<2x256xf32> -> vector<2x256xf32>
      %c0_22 = arith.constant 0 : index
      %c0_23 = arith.constant 0 : index
      %34 = vector.load %arg4[%c0_22, %c0_23] : memref<1x256xf32, #tpu.memory_space<vmem>>, vector<1x256xf32>
      %35 = vector.broadcast %34 : vector<1x256xf32> to vector<2x256xf32>
      %36 = arith.addf %33, %35 : vector<2x256xf32>
      %37 = arith.mulf %36, %36 : vector<2x256xf32>
      %cst_24 = arith.constant dense<0.000000e+00> : vector<2xf32>
      %38 = vector.multi_reduction <add>, %37, %cst_24 [1] : vector<2x256xf32> to vector<2xf32>
      %39 = vector.shape_cast %38 : vector<2xf32> to vector<2x1xf32>
      %40 = math.sqrt %39 : vector<2x1xf32>
      %cst_25 = arith.constant 9.99999997E-7 : f32
      %41 = vector.broadcast %cst_25 : f32 to vector<2x1xf32>
      %42 = arith.addf %40, %41 : vector<2x1xf32>
      %43 = vector.broadcast %42 : vector<2x1xf32> to vector<2x256xf32>
      %44 = arith.divf %36, %43 : vector<2x256xf32>
      %c0_26 = arith.constant 0 : index
      %c0_27 = arith.constant 0 : index
      %45 = vector.load %arg5[%c0_26, %c0_27] : memref<2x256xf32, #tpu.memory_space<vmem>>, vector<2x256xf32>
      tpu.vector_store %arg5[%c0_26, %c0_27], %44 {strides = array<i32>} : memref<2x256xf32, #tpu.memory_space<vmem>>, vector<2x256xf32>,
    } else {
    }
    return
  }
  func.func @transform_0(%arg0: i32, %arg1: i32) -> (i32, i32, i32) {
    %c0_i32 = arith.constant 0 : i32
    %c0_i32_0 = arith.constant 0 : i32
    return %arg0, %arg1, %c0_i32 : i32, i32, i32
  }
  func.func @transform_1(%arg0: i32, %arg1: i32) -> (i32, i32) {
    %c0_i32 = arith.constant 0 : i32
    %c0_i32_0 = arith.constant 0 : i32
    %c0_i32_1 = arith.constant 0 : i32
    return %c0_i32, %c0_i32_0 : i32, i32
  }
  func.func @transform_2(%arg0: i32, %arg1: i32) -> (i32, i32) {
    %c0_i32 = arith.constant 0 : i32
    %c0_i32_0 = arith.constant 0 : i32
    %c0_i32_1 = arith.constant 0 : i32
    return %c0_i32, %c0_i32_0 : i32, i32
  }
  func.func @transform_3(%arg0: i32, %arg1: i32) -> (i32, i32) {
    %c0_i32 = arith.constant 0 : i32
    %c0_i32_0 = arith.constant 0 : i32
    return %arg0, %c0_i32 : i32, i32
  }
}

</mosaic_0001>

<bundles_post_ra>
// kernel: global_descriptor_forward.1
= control target key start
LH: loop header
LB: loop body
LE: loop exit
PB: predicated region body
PF: predicated region fallthrough
CT: control target
= control target key end

     0   :  { %8 = vsyncpa [#allocation4], 0  ;;  %s1413_s0 = inlined_call_operand.hbm [shape: bf16[2,256,128], index: 0, kind: input, shape index: {}]   ;;  %s1414_s1 = inlined_call_operand.hbm [shape: bf16[128,256], index: 1, kind: input, shape index: {}]   ;;  %s1415_s2 = inlined_call_operand.vmem [shape: f32[1,256], index: 2, kind: input, shape index: {}]   ;;  %s1416_s3 = inlined_call_operand.hbm [shape: f32[2,256], index: 3, kind: output, shape index: {}]  }
   0x1   :  { %10 = vsyncpa [#allocation4 + $0x1], 0 }
   0x2   :  { %11 = vsyncpa [#allocation7], 0 }
   0x3   :  { %12 = vsyncpa [#allocation5], 0  ;;  %s1186_s12 = smov 0   ;;  %s1188_s13 = smov 0  }
   0x4   :  { %s1190_s14 = smov 0   ;;  %s1192_s15 = smov 0  }
   0x5   :  { %s1194_s16 = smov 0   ;;  %s1196_s17 = smov 0  }
   0x6 LB: > { %s766_s18 = sadd.s32 4294967295, %s1152_s17   ;;  %s27_s19 = sadd.s32 1, %s1148_s16  ;;  %s1152_s17 = sphi %s1196_s17, %s18_s17   ;;  %s1148_s16 = sphi %s1194_s16, %s1428_s16   ;;  %s1144_s15 = sphi %s1192_s15, %s1427_s15   ;;  %s1140_s14 = sphi %s1190_s14, %s1426_s14   ;;  %s1136_s13 = sphi %s1188_s13, %s1425_s13   ;;  %s1132_s12 = sphi %s1186_s12, %s1424_s12  }
   0x7   : > { %p28_p0 = scmp.ge.s32.totalorder %s27_s19, 2  ;;  %s39_s20 = sadd.s32 1, %s1140_s14 }
   0x8   : > { %p46_p1 = scmp.ne.s32.totalorder %s1140_s14, %s1136_s13  ;;  %p47_p2 = scmp.eq.s32.totalorder %s1152_s17, 0 }
   0x9   : > { %s1430_s19 = smov (%p28_p0, %s27_s19), 0  ;;  %p52_p4 = scmp.ne.s32.totalorder %s1136_s13, %s1132_s12 }
   0xa   : > { %p1222_p3 = por %p47_p2, %p46_p1  ;;  %s35_s22 = ssub.s32 %s1148_s16, %s1430_s19 }
   0xb   : > { %p1231_p5 = scmp.eq.s32.totalorder %s766_s18, 0  ;;  %p37_p6 = scmp.eq.s32.totalorder %s35_s22, 0 }
   0xc   : > { %p767_p7 = scmp.ge.s32.totalorder %s1152_s17, 1  ;;  %p131_p9 = scmp.lt.s32.totalorder %s1152_s17, 3 }
   0xd   : > { %p1238_p8 = por %p1231_p5, %p52_p4  ;;  %s1154_s27 = smov [#allocation6]  }
   0xe   : > { %s1244_s25 = scalar_select %p37_p6, %s1140_s14, %s39_s20  }
   0xf   : > { %s1420_s24 = scalar_select %p1238_p8, 1, 0 }
  0x10   : > { %p1246_p10 = pnand %p767_p7, %p131_p9  ;;  %s143_s28 = sshll.u32 %s1154_s27, 4  ;;  %s144_s28 = int_to_ptr.vmem [resolvable:$true] %s143_s28 }
  0x11   : > { %s1055_s29 = scalar_lea.vmem %s144_s28, 2048  ;;  %p1063_p4 = scmp.lt.s32.totalorder %s144_s28, %s144_s28 }
  0x12   : > { %p934_p11 = pneg %p1246_p10  ;;  %p1056_p0 = scmp.ne.s32.totalorder %s144_s28, %s1055_s29 }
  0x13   : > { %p1064_p6 = scmp.lt.s32.totalorder %s1055_s29, %s1055_s29 }
  0x14   : > { %p935_p12 = pnand %p934_p11, %p1231_p5 }
  0x15   : > { %p1065_p8 = por %p1064_p6, %p1063_p4 }
  0x16   : > { %p1046_p13 = pneg %p935_p12 }
  0x18   : > { %p1058_p1 = pnand %p1056_p0, %p1046_p13 }
  0x1a   : > { %p1059_p2 = pneg %p1058_p1 }
  0x1c   : > { %p1066_p7 = pnand %p1065_p8, %p1059_p2 }
  0x1e   : > { %1069 = shalt.err (!%p1066_p7)
}
  0x1f   : > { %s1155_s30 = smov 128   ;;  %s1156_s4 = smov 8  }
  0x20   : > { %937 = dma.hbm_to_vmem [thread:$0]  (!%p935_p12), %s1414_s1, 2048, %s144_s28, [#allocation7], %s1155_s30, %s1155_s30, %s1156_s4  }
  0x21   : > { %p769_p9 = scmp.ge.s32.totalorder %s1152_s17, 2 }
  0x23   : > { %156 = sbr.rel (%p769_p9) target bundleno = 53 (0x35), region = 24 }
  0x28   : > { %s160_s7 = sand.u32 1, %s1140_s14   ;;  %s801_s8 = sshll.u32 %s1148_s16, 10 }
  0x29   : > { %s770_s9 = sshll.u32 %s160_s7, 7  ;;  %s173_s12 = scalar_lea.hbm %s1413_s0, %s801_s8 }
  0x2a   : > { %s919_s20 = scalar_select %p1222_p3, [#allocation0], [#allocation11] }
  0x2b   : > { %s164_s22 = scalar_lea.vmem [#allocation3], %s770_s9  ;;  %s1157_s29 = smov 2048  }
  0x2c   : > { %s186_s27 = sshll.u32 %s164_s22, 4  ;;  %s178_s28 = sld [smem:[%s919_s20]]   ;;  %s187_s27 = int_to_ptr.vmem [resolvable:$true] %s186_s27 }
  0x2d   : > { %920 = sst [smem:[#allocation10]] (%p1222_p3), %s1157_s29  ;;  %s1158_s30 = smov 1024  }
  0x2e   : > { %921 = sst [smem:[#allocation10 + $0x1]] (%p1222_p3), %s1158_s30  ;;  %s1159_s4 = smov 16  }
  0x2f   : > { %922 = sst [smem:[#allocation10 + $0x2]] (%p1222_p3), %s1159_s4  ;;  %s1160_s5 = smov 64  }
  0x30   : > { %923 = sst [smem:[#allocation10 + $0x3]] (%p1222_p3), %s1160_s5  ;;  %s1161_s8 = smov 4  }
  0x31   : > { %924 = sst [smem:[#allocation10 + $0x4]] (%p1222_p3), %s1160_s5  ;;  %s161_s10 = scalar_lea.sflag [#allocation4], %s160_s7 }
  0x32   : > { %s773_s6 = sshll.u32 %s178_s28, 26  ;;  %925 = sst [smem:[#allocation10 + $0x5]] (%p1222_p3), %s1161_s8 }
  0x33   : > { %s774_s9 = sadd.s32 134217728, %s773_s6  ;;  %s1162_s11 = smov 131072  }
  0x34   : > { %926 = dma.general (%p1222_p3), %s173_s12, 2048, %s187_s27, %s161_s10, %s1162_s11, [#allocation10], %s774_s9, 0  }
  0x35 PF: > { %211 = sbr.rel (%p1246_p10) target bundleno = 765 (0x2fd), region = 32  ;;  %s213_s20 = sand.u32 (!%p1246_p10), 1, %s1136_s13  }
  0x36   : > { %s776_s22 = sshll.u32 (!%p1246_p10), %s213_s20, 7  ;;  %s214_s29 = scalar_lea.sflag (!%p1246_p10), [#allocation4], %s213_s20 }
  0x37   : > { %s1282_s30 = scalar_lea.vmem (!%p1246_p10), [#allocation3], %s776_s22  ;;  %p1422_p8 = scmp.ne.s32.totalorder (!%p1246_p10), %s1420_s24, 0 }
  0x3a   : > { %1119 = dma.done.wait (%p1422_p8), %s214_s29, 2048  }
  0x3b   : > { %1121 = vsyncadd (%p1422_p8), %s214_s29, 4294965248 }
  0x3c   : > { %1123 = dma.done.wait (%p1231_p5), [#allocation7], 2048  }
  0x3d   : > { %1125 = vsyncadd (%p1231_p5), [#allocation7], 4294965248  ;;  %p778_p3 = scmp.ne.s32.totalorder %s1144_s15, 0 }
  0x3f   : > { %245 = sbr.rel (%p778_p3) target bundleno = 70 (0x46), region = 44 }
  0x44   : > { %v1163_v0 = vmov 0.0  }
  0x45   : > { %246 = vst [vmem:[#allocation2] sm:$0xff] %v1163_v0  ;;  %247 = vst [vmem:[#allocation2 + $0x8] sm:$0xff] %v1163_v0 }
  0x46 PF: > { %v803_v1 = vld [vmem:[%s1282_s30] sm:$0xff]   ;;  %v866_v2 = vld [vmem:[%s1282_s30 + $0x8] sm:$0xff]   ;;  %v867_v4 = vld [vmem:[%s1282_s30 + $0x10] sm:$0xff]   ;;  %p779_p5 = scmp.ne.s32.totalorder %s1144_s15, 1 }
  0x47   : > { %v873_v3 = vld [vmem:[%s1282_s30 + $0x40] sm:$0xff]   ;;  %v1298_v5 = vld [vmem:[%s1282_s30 + $0x18] sm:$0xff]   ;;  %v804_v6 = vunpack.c.l.bf16 %v803_v1  ;;  %v805_v7 = vunpack.c.h.bf16 %v803_v1  ;;  %v1304_v9 = vld [vmem:[%s1282_s30 + $0x28] sm:$0xff]   ;;  %v808_v11 = vunpack.c.l.bf16 %v866_v2  ;;  %v809_v12 = vunpack.c.h.bf16 %v866_v2 }
  0x48   : > { %v1301_v8 = vld [vmem:[%s1282_s30 + $0x20] sm:$0xff]   ;;  %v874_v10 = vld [vmem:[%s1282_s30 + $0x48] sm:$0xff]   ;;  %v1308_v13 = vld [vmem:[%s1282_s30 + $0x30] sm:$0xff]   ;;  %v836_v14 = vunpack.c.l.bf16 %v873_v3  ;;  %v837_v15 = vunpack.c.h.bf16 %v873_v3  ;;  %v812_v16 = vunpack.c.l.bf16 %v867_v4  ;;  %v813_v17 = vunpack.c.h.bf16 %v867_v4 }
  0x49   : > { %v816_v18 = vunpack.c.l.bf16 %v1298_v5  ;;  %v817_v19 = vunpack.c.h.bf16 %v1298_v5  ;;  %v820_v20 = vunpack.c.l.bf16 %v1301_v8  ;;  %v821_v21 = vunpack.c.h.bf16 %v1301_v8  ;;  %v1316_v23 = vld [vmem:[%s1282_s30 + $0x38] sm:$0xff]   ;;  %v875_v25 = vld [vmem:[%s1282_s30 + $0x50] sm:$0xff]   ;;  %v1323_v30 = vld [vmem:[%s1282_s30 + $0x60] sm:$0xff]  }
  0x4a   : > { %v824_v22 = vunpack.c.l.bf16 %v1304_v9  ;;  %v840_v24 = vunpack.c.l.bf16 %v874_v10  ;;  %v825_v26 = vunpack.c.h.bf16 %v1304_v9  ;;  %v828_v27 = vunpack.c.l.bf16 %v1308_v13  ;;  %v876_v29 = vld [vmem:[%s1282_s30 + $0x58] sm:$0xff]   ;;  %v1329_v42 = vld [vmem:[%s1282_s30 + $0x68] sm:$0xff]   ;;  %v1332_v43 = vld [vmem:[%s1282_s30 + $0x70] sm:$0xff]  }
  0x4b   : > { %v841_v28 = vunpack.c.h.bf16 %v874_v10  ;;  %v312_v31 = vmax.f32 %v804_v6, 1e-06  ;;  %v829_v32 = vunpack.c.h.bf16 %v1308_v13  ;;  %v313_v33 = vmax.f32 %v805_v7, 1e-06  ;;  %v1341_v58 = vld [vmem:[%s1282_s30 + $0x78] sm:$0xff]  }
  0x4c   : > { %v328_v34 = vmax.f32 %v836_v14, 1e-06  ;;  %v329_v35 = vmax.f32 %v837_v15, 1e-06  ;;  %v832_v36 = vunpack.c.l.bf16 %v1316_v23  ;;  %v833_v37 = vunpack.c.h.bf16 %v1316_v23 }
  0x4d   : > { %v844_v38 = vunpack.c.l.bf16 %v875_v25  ;;  %v845_v39 = vunpack.c.h.bf16 %v875_v25  ;;  %v848_v40 = vunpack.c.l.bf16 %v876_v29  ;;  %v849_v41 = vunpack.c.h.bf16 %v876_v29 }
  0x4e   : > { %v314_v44 = vmax.f32 %v808_v11, 1e-06  ;;  %v330_v45 = vmax.f32 %v840_v24, 1e-06  ;;  %v852_v46 = vunpack.c.l.bf16 %v1323_v30  ;;  %v853_v47 = vunpack.c.h.bf16 %v1323_v30 }
  0x4f   : > { %v315_v48 = vmax.f32 %v809_v12, 1e-06  ;;  %v331_v49 = vmax.f32 %v841_v28, 1e-06  ;;  %v344_v50 = vmul.f32 %v312_v31, %v312_v31  ;;  %v345_v51 = vmul.f32 %v313_v33, %v313_v33 }
  0x50   : > { %v360_v52 = vmul.f32 %v328_v34, %v328_v34  ;;  %v361_v53 = vmul.f32 %v329_v35, %v329_v35  ;;  %v856_v54 = vunpack.c.l.bf16 %v1329_v42  ;;  %v857_v55 = vunpack.c.h.bf16 %v1329_v42 }
  0x51   : > { %v860_v56 = vunpack.c.l.bf16 %v1332_v43  ;;  %v861_v57 = vunpack.c.h.bf16 %v1332_v43  ;;  %v316_v59 = vmax.f32 %v812_v16, 1e-06  ;;  %v332_v60 = vmax.f32 %v844_v38, 1e-06 }
  0x52   : > { %v346_v61 = vmul.f32 %v314_v44, %v314_v44  ;;  %v362_v62 = vmul.f32 %v330_v45, %v330_v45  ;;  %v317_v63 = vmax.f32 %v813_v17, 1e-06  ;;  %v333_v0 = vmax.f32 %v845_v39, 1e-06 }
  0x53   : > { %v347_v1 = vmul.f32 %v315_v48, %v315_v48  ;;  %v363_v2 = vmul.f32 %v331_v49, %v331_v49  ;;  %v376_v3 = vmul.f32 %v344_v50, %v312_v31  ;;  %v377_v4 = vmul.f32 %v345_v51, %v313_v33 }
  0x54   : > { %v392_v5 = vmul.f32 %v360_v52, %v328_v34  ;;  %v393_v6 = vmul.f32 %v361_v53, %v329_v35  ;;  %v864_v7 = vunpack.c.l.bf16 %v1341_v58  ;;  %v865_v10 = vunpack.c.h.bf16 %v1341_v58 }
  0x55   : > { %v318_v11 = vmax.f32 %v816_v18, 1e-06  ;;  %v334_v12 = vmax.f32 %v848_v40, 1e-06  ;;  %v348_v14 = vmul.f32 %v316_v59, %v316_v59  ;;  %v364_v15 = vmul.f32 %v332_v60, %v332_v60 }
  0x56   : > { %v378_v16 = vmul.f32 %v346_v61, %v314_v44  ;;  %v394_v24 = vmul.f32 %v362_v62, %v330_v45  ;;  %v319_v25 = vmax.f32 %v817_v19, 1e-06  ;;  %v335_v28 = vmax.f32 %v849_v41, 1e-06 }
  0x57   : > { %v349_v17 = vmul.f32 %v317_v63, %v317_v63  ;;  %v365_v29 = vmul.f32 %v333_v0, %v333_v0  ;;  %v379_v30 = vmul.f32 %v347_v1, %v315_v48  ;;  %v395_v38 = vmul.f32 %v363_v2, %v331_v49 }
  0x58   : > { %v410_v31 = vadd.f32 %v377_v4, %v376_v3  ;;  %v425_v33 = vadd.f32 %v393_v6, %v392_v5  ;;  %v320_v34 = vmax.f32 %v820_v20, 1e-06  ;;  %v336_v35 = vmax.f32 %v852_v46, 1e-06 }
  0x59   : > { %v350_v39 = vmul.f32 %v318_v11, %v318_v11  ;;  %v366_v42 = vmul.f32 %v334_v12, %v334_v12  ;;  %v380_v18 = vmul.f32 %v348_v14, %v316_v59  ;;  %v396_v40 = vmul.f32 %v364_v15, %v332_v60 }
  0x5a   : > { %v411_v50 = vadd.f32 %v410_v31, %v378_v16  ;;  %v426_v51 = vadd.f32 %v425_v33, %v394_v24  ;;  %v321_v19 = vmax.f32 %v821_v21, 1e-06  ;;  %v337_v41 = vmax.f32 %v853_v47, 1e-06 }
  0x5b   : > { %v351_v44 = vmul.f32 %v319_v25, %v319_v25  ;;  %v367_v45 = vmul.f32 %v335_v28, %v335_v28  ;;  %v381_v48 = vmul.f32 %v349_v17, %v317_v63  ;;  %v397_v49 = vmul.f32 %v365_v29, %v333_v0 }
  0x5c   : > { %v412_v52 = vadd.f32 %v411_v50, %v379_v30  ;;  %v427_v53 = vadd.f32 %v426_v51, %v395_v38  ;;  %v322_v20 = vmax.f32 %v824_v22, 1e-06  ;;  %v338_v46 = vmax.f32 %v856_v54, 1e-06 }
  0x5d   : > { %v352_v61 = vmul.f32 %v320_v34, %v320_v34  ;;  %v368_v62 = vmul.f32 %v336_v35, %v336_v35  ;;  %v382_v59 = vmul.f32 %v350_v39, %v318_v11  ;;  %v398_v60 = vmul.f32 %v366_v42, %v334_v12 }
  0x5e   : > { %v413_v1 = vadd.f32 %v412_v52, %v380_v18  ;;  %v428_v2 = vadd.f32 %v427_v53, %v396_v40  ;;  %v323_v8 = vmax.f32 %v825_v26, 1e-06  ;;  %v339_v21 = vmax.f32 %v857_v55, 1e-06 }
  0x5f   : > { %v353_v47 = vmul.f32 %v321_v19, %v321_v19  ;;  %v369_v3 = vmul.f32 %v337_v41, %v337_v41  ;;  %v383_v63 = vmul.f32 %v351_v44, %v319_v25  ;;  %v399_v0 = vmul.f32 %v367_v45, %v335_v28 }
  0x60   : > { %v414_v4 = vadd.f32 %v413_v1, %v381_v48  ;;  %v429_v5 = vadd.f32 %v428_v2, %v397_v49  ;;  %v324_v22 = vmax.f32 %v828_v27, 1e-06  ;;  %v340_v54 = vmax.f32 %v860_v56, 1e-06  ;;  %v408_v1 = vld [vmem:[#allocation2] sm:$0xff]  ;;  %v409_v2 = vld [vmem:[#allocation2 + $0x8] sm:$0xff] }
  0x61   : > { %v354_v6 = vmul.f32 %v322_v20, %v322_v20  ;;  %v370_v11 = vmul.f32 %v338_v46, %v338_v46  ;;  %v384_v12 = vmul.f32 %v352_v61, %v320_v34  ;;  %v400_v14 = vmul.f32 %v368_v62, %v336_v35 }
  0x62   : > { %v415_v15 = vadd.f32 %v414_v4, %v382_v59  ;;  %v430_v9 = vadd.f32 %v429_v5, %v398_v60  ;;  %v325_v26 = vmax.f32 %v829_v32, 1e-06  ;;  %v341_v55 = vmax.f32 %v861_v57, 1e-06 }
  0x63   : > { %v355_v16 = vmul.f32 %v323_v8, %v323_v8  ;;  %v371_v24 = vmul.f32 %v339_v21, %v339_v21  ;;  %v385_v25 = vmul.f32 %v353_v47, %v321_v19  ;;  %v401_v28 = vmul.f32 %v369_v3, %v337_v41 }
  0x64   : > { %v416_v27 = vadd.f32 %v415_v15, %v383_v63  ;;  %v431_v17 = vadd.f32 %v430_v9, %v399_v0  ;;  %v326_v56 = vmax.f32 %v832_v36, 1e-06  ;;  %v342_v29 = vmax.f32 %v864_v7, 1e-06 }
  0x65   : > { %v356_v30 = vmul.f32 %v324_v22, %v324_v22  ;;  %v372_v38 = vmul.f32 %v340_v54, %v340_v54  ;;  %v386_v31 = vmul.f32 %v354_v6, %v322_v20  ;;  %v402_v13 = vmul.f32 %v370_v11, %v338_v46 }
  0x66   : > { %v417_v32 = vadd.f32 %v416_v27, %v384_v12  ;;  %v432_v33 = vadd.f32 %v431_v17, %v400_v14  ;;  %v327_v43 = vmax.f32 %v833_v37, 1e-06  ;;  %v343_v57 = vmax.f32 %v865_v10, 1e-06 }
  0x67   : > { %v357_v34 = vmul.f32 %v325_v26, %v325_v26  ;;  %v373_v35 = vmul.f32 %v341_v55, %v341_v55  ;;  %v387_v39 = vmul.f32 %v355_v16, %v323_v8  ;;  %v403_v42 = vmul.f32 %v371_v24, %v339_v21 }
  0x68   : > { %v418_v36 = vadd.f32 %v417_v32, %v385_v25  ;;  %v433_v18 = vadd.f32 %v432_v33, %v401_v28  ;;  %v358_v40 = vmul.f32 %v326_v56, %v326_v56  ;;  %v374_v7 = vmul.f32 %v342_v29, %v342_v29 }
  0x69   : > { %v388_v50 = vmul.f32 %v356_v30, %v324_v22  ;;  %v404_v51 = vmul.f32 %v372_v38, %v340_v54  ;;  %v359_v44 = vmul.f32 %v327_v43, %v327_v43  ;;  %v375_v45 = vmul.f32 %v343_v57, %v343_v57 }
  0x6a   : > { %v419_v19 = vadd.f32 %v418_v36, %v386_v31  ;;  %v434_v41 = vadd.f32 %v433_v18, %v402_v13  ;;  %v389_v48 = vmul.f32 %v357_v34, %v325_v26  ;;  %v405_v23 = vmul.f32 %v373_v35, %v341_v55 }
  0x6b   : > { %v390_v58 = vmul.f32 %v358_v40, %v326_v56  ;;  %v406_v10 = vmul.f32 %v374_v7, %v342_v29  ;;  %v391_v20 = vmul.f32 %v359_v44, %v327_v43  ;;  %v407_v46 = vmul.f32 %v375_v45, %v343_v57 }
  0x6c   : > { %v420_v37 = vadd.f32 %v419_v19, %v387_v39  ;;  %v435_v49 = vadd.f32 %v434_v41, %v403_v42 }
  0x6e   : > { %v421_v52 = vadd.f32 %v420_v37, %v388_v50  ;;  %v436_v53 = vadd.f32 %v435_v49, %v404_v51 }
  0x70   : > { %v422_v61 = vadd.f32 %v421_v52, %v389_v48  ;;  %v437_v62 = vadd.f32 %v436_v53, %v405_v23 }
  0x72   : > { %v423_v59 = vadd.f32 %v422_v61, %v390_v58  ;;  %v438_v60 = vadd.f32 %v437_v62, %v406_v10 }
  0x74   : > { %v424_v8 = vadd.f32 %v423_v59, %v391_v20  ;;  %v439_v21 = vadd.f32 %v438_v60, %v407_v46  ;;  %447 = sbr.rel (%p779_p5) target bundleno = 750 (0x2ee), region = 48 }
  0x76   : > { %v440_v47 = vadd.f32 %v424_v8, %v408_v1  ;;  %v441_v3 = vadd.f32 %v439_v21, %v409_v2 }
  0x78   : > { %442 = vst [vmem:[#allocation2] sm:$0xff] %v440_v47  ;;  %443 = vst [vmem:[#allocation2 + $0x8] sm:$0xff] %v441_v3 }
  0x79   : > { %vm470_vm10 = vcmask 1041409   ;;  %vm473_vm11 = vcmask 1041408   ;;  %v1002_v44 = vld [vmem:[#allocation6 + $0x74] ss:$8 sps:$4 sm:$0xff]   ;;  %v1004_v45 = vld [vmem:[#allocation6 + $0x70] ss:$8 sps:$4 sm:$0xff]  }
  0x7a   : > { %611 = vmatprep.subr.bf16.mxu0 %v1002_v44  ;;  %v1005_v48 = vld [vmem:[#allocation6 + $0x64] ss:$8 sps:$4 sm:$0xff]   ;;  %v1007_v23 = vld [vmem:[#allocation6 + $0x60] ss:$8 sps:$4 sm:$0xff]   ;;  %v1008_v37 = vld [vmem:[#allocation6 + $0x54] ss:$8 sps:$4 sm:$0xff]  }
  0x7b   : > { %612 = vmatpush1.bf16.msra.mxu0 %v1004_v45  ;;  %v1010_v49 = vld [vmem:[#allocation6 + $0x50] ss:$8 sps:$4 sm:$0xff]   ;;  %v1011_v58 = vld [vmem:[#allocation6 + $0x44] ss:$8 sps:$4 sm:$0xff]   ;;  %v1013_v10 = vld [vmem:[#allocation6 + $0x40] ss:$8 sps:$4 sm:$0xff]  }
  0x7c   : > { %613 = vmatprep.subr.bf16.mxu0 %v1005_v48  ;;  %v1014_v52 = vld [vmem:[#allocation6 + $0x34] ss:$8 sps:$4 sm:$0xff]   ;;  %v1164_v53 = vmov 0   ;;  %v1016_v20 = vld [vmem:[#allocation6 + $0x30] ss:$8 sps:$4 sm:$0xff]  }
  0x7d   : > { %643 = vmatprep.mubr.bf16.mxu0 %v1164_v53  ;;  %v1017_v46 = vld [vmem:[#allocation6 + $0x24] ss:$8 sps:$4 sm:$0xff]   ;;  %v1019_v61 = vld [vmem:[#allocation6 + $0x20] ss:$8 sps:$4 sm:$0xff]   ;;  %v1020_v62 = vld [vmem:[#allocation6 + $0x14] ss:$8 sps:$4 sm:$0xff]  }
  0x7e   : > { %v1022_v59 = vld [vmem:[#allocation6 + $0x10] ss:$8 sps:$4 sm:$0xff]   ;;  %v1023_v60 = vld [vmem:[#allocation6 + $0x4] ss:$8 sps:$4 sm:$0xff]   ;;  %v1025_v1 = vld [vmem:[#allocation6] ss:$8 sps:$4 sm:$0xff]  }
  0x7f   : > { %v448_v63 = vld [vmem:[#allocation2] sm:$0xff]  ;;  %v449_v0 = vld [vmem:[#allocation2 + $0x8] sm:$0xff]  ;;  %614 = vmatpush1.bf16.msra.mxu0 %v1007_v23 }
  0x80   : > { %v450_v4 = vrot.slane %v448_v63, 4  ;;  %v456_v5 = vrot.slane %v449_v0, 4  ;;  %615 = vmatprep.subr.bf16.mxu0 %v1008_v37 }
  0x82   : > { %v451_v22 = vadd.f32 %v450_v4, %v448_v63  ;;  %v457_v54 = vadd.f32 %v456_v5, %v449_v0 }
  0x83   : > { %616 = vmatpush1.bf16.msra.mxu0 %v1010_v49 }
  0x84   : > { %v452_v6 = vrot.slane %v451_v22, 2  ;;  %v458_v11 = vrot.slane %v457_v54, 2  ;;  %617 = vmatprep.subr.bf16.mxu0 %v1011_v58 }
  0x86   : > { %v453_v12 = vadd.f32 %v452_v6, %v451_v22  ;;  %v459_v14 = vadd.f32 %v458_v11, %v457_v54 }
  0x87   : > { %618 = vmatpush1.bf16.msra.mxu0 %v1013_v10 }
  0x88   : > { %v454_v15 = vrot.slane %v453_v12, 1  ;;  %v460_v9 = vrot.slane %v459_v14, 1  ;;  %619 = vmatprep.subr.bf16.mxu0 %v1014_v52 }
  0x8a   : > { %v455_v26 = vadd.f32 %v454_v15, %v453_v12  ;;  %v461_v55 = vadd.f32 %v460_v9, %v459_v14 }
  0x8b   : > { %620 = vmatpush1.bf16.msra.mxu0 %v1016_v20 }
  0x8c   : > { %v462_v16 = vmul.f32 0.00390625, %v455_v26  ;;  %v463_v24 = vmul.f32 0.00390625, %v461_v55  ;;  %621 = vmatprep.subr.bf16.mxu0 %v1017_v46 }
  0x8e   : > { %v883_v25 = vand.u32 2147483647, %v462_v16  ;;  %v901_v28 = vand.u32 2147483647, %v463_v24  ;;  %v887_v30 = vand.u32 2147483648, %v462_v16  ;;  %v905_v38 = vand.u32 2147483648, %v463_v24 }
  0x8f   : > { %vm882_vm3 = vcmp.lt.f32.partialorder %v462_v16, 0.0  ;;  %vm881_vm5 = vcmp.eq.f32.partialorder %v462_v16, 0.0  ;;  %vm900_vm6 = vcmp.lt.f32.partialorder %v463_v24, 0.0  ;;  %vm899_vm8 = vcmp.eq.f32.partialorder %v463_v24, 0.0  ;;  %622 = vmatpush1.bf16.msra.mxu0 %v1019_v61 }
  0x90   : > { %1026 = vlog2.f32 %v883_v25  ;;  %vm891_vm0 = vweird.f32 %v883_v25  ;;  %vm893_vm1 = vcmp.eq.f32.partialorder %v883_v25, 0.0  ;;  %vm909_vm2 = vweird.f32 %v901_v28  ;;  %623 = vmatprep.subr.bf16.mxu0 %v1020_v62 }
  0x91   : > { %1028 = vlog2.f32 %v901_v28  ;;  %vm911_vm4 = vcmp.eq.f32.partialorder %v901_v28, 0.0  ;;  %vm884_vm7 = vcmp.eq.f32.partialorder %v883_v25, inf  ;;  %vm902_vm9 = vcmp.eq.f32.partialorder %v901_v28, inf  ;;  %v511_v28 = vld [vmem:[%s1415_s2] sm:$0x3] }
  0x93   : > { %624 = vmatpush1.bf16.msra.mxu0 %v1022_v59 }
  0x94   : > { %625 = vmatprep.subr.bf16.mxu0 %v1023_v60 }
  0x97   : > { %626 = vmatpush1.bf16.msra.mxu0 %v1025_v1 }
  0x9d   : > { %v1027_v27 = vpop.eup %1026 }
  0x9e   : > { %v1029_v17 = vpop.eup %1028  ;;  %v888_v56 = vmul.f32 0.33333334, %v1027_v27 }
  0x9f   : > { %v906_v29 = vmul.f32 0.33333334, %v1029_v17 }
  0xa0   : > { %1030 = vpow2.f32 %v888_v56 }
  0xa1   : > { %1032 = vpow2.f32 %v906_v29 }
  0xad   : > { %v1031_v31 = vpop.eup %1030 }
  0xae   : > { %v1033_v13 = vpop.eup %1032  ;;  %v890_v32 = vor.u32 %v1031_v31, %v887_v30 }
  0xaf   : > { %v908_v33 = vor.u32 %v1033_v13, %v905_v38 }
  0xb0   : > { %v892_v43 = vsel %vm891_vm0, %v462_v16, %v890_v32  ;;  %v513_v16 = vlaneseq }
  0xb1   : > { %v895_v57 = vsel %vm893_vm1, %v887_v30, %v892_v43  ;;  %v910_v34 = vsel %vm909_vm2, %v463_v24, %v908_v33 }
  0xb2   : > { %v896_v35 = vsel %vm882_vm3, nan, %v895_v57  ;;  %v913_v39 = vsel %vm911_vm4, %v905_v38, %v910_v34  ;;  %v514_v24 = vshrl.u32 %v513_v16, 7 }
  0xb3   : > { %v897_v42 = vsel %vm881_vm5, 0.0, %v896_v35  ;;  %v914_v36 = vsel %vm900_vm6, nan, %v913_v39 }
  0xb4   : > { %v898_v18 = vsel %vm884_vm7, inf, %v897_v42  ;;  %v915_v40 = vsel %vm899_vm8, 0.0, %v914_v36  ;;  %v515_v25 = vsub.s32 0, %v514_v24  ;;  %v519_v27 = vsub.s32 1, %v514_v24 }
  0xb5   : > { %v916_v7 = vsel %vm902_vm9, inf, %v915_v40  ;;  %v466_v50 = vmul.f32 %v898_v18, %v898_v18 }
  0xb6   : > { %v467_v51 = vmul.f32 %v916_v7, %v916_v7  ;;  %v516_v17 = vrot.slane %v511_v28, %v515_v25  ;;  %v520_v56 = vrot.slane %v511_v28, %v519_v27 }
  0xb8   : > { %v471_v19 = vsel %vm470_vm10, %v467_v51, %v466_v50 }
  0xb9   : > { %v474_v41 = vsel %vm473_vm11, %v471_v19, 0.0 }
  0xba   : > { %475 = vadd.xlane.f32.xlu0 %v474_v41 }
 0x143   : > { %v476_v2 = vpop.xlane.xlu0 %475 }
 0x144   : > { %1034 = vrsqrt.f32 %v476_v2  ;;  %vm479_vm12 = vcmp.eq.f32.partialorder %v476_v2, inf  ;;  %v482_v47 = vand.u32 2147483648, %v476_v2  ;;  %vm481_vm13 = vcmp.eq.f32.partialorder %v476_v2, 0.0 }
 0x151   : > { %v1035_v8 = vpop.eup %1034 }
 0x152   : > { %v478_v21 = vmul.f32 %v1035_v8, %v476_v2 }
 0x154   : > { %v480_v3 = vsel %vm479_vm12, %v476_v2, %v478_v21 }
 0x155   : > { %v483_v63 = vsel %vm481_vm13, %v482_v47, %v480_v3 }
 0x156   : > { %v484_v0 = vadd.f32 1e-06, %v483_v63 }
 0x158   : > { %v486_v4 = vrot.slane %v484_v0, 1  ;;  %1036 = vrcp.f32 %v484_v0 }
 0x15a   : > { %1038 = vrcp.f32 %v486_v4 }
 0x165   : > { %v1037_v5 = vpop.eup %1036 }
 0x166   : > { %v490_v22 = vmul.f32 %v1037_v5, %v898_v18 }
 0x167   : > { %v1039_v54 = vpop.eup %1038 }
 0x168   : > { %v492_v6 = vmul.f32 %v1039_v54, %v916_v7  ;;  %v493_v11 = vpack.c.bf16 %v490_v22, %v490_v22 }
 0x16a   : > { %v494_v12 = vpack.c.bf16 %v492_v6, %v492_v6  ;;  %v525_v15 = vunpack.c.l.b16 %v493_v11 }
 0x16c   : > { %v526_v14 = vunpack.c.l.b16 %v494_v12 }
 0x16e   : > { %v527_v9 = vrot.slane %v526_v14, 7 }
 0x170   : > { %v528_v26 = vsel %vm470_vm10, %v527_v9, %v525_v15 }
 0x171   : > { %v529_v55 = vpack.c.b16 %v528_v26, %v528_v26 }
 0x173   : > { %644 = vmatmul.mubr.bf16.vlgmr.msra.gmra.mxu0 %v529_v55 }
 0x233   : > { %v645_v29 = vpop.f32.mrf.mxu0 }
 0x234   : > { %v646_v30 = vadd.f32 %v645_v29, %v516_v17 }
 0x235   : > { %v647_v38 = vpop.f32.mrf.mxu0 }
 0x236   : > { %v652_v31 = vmul.f32 %v646_v30, %v646_v30  ;;  %v648_v13 = vadd.f32 %v647_v38, %v520_v56 }
 0x237   : > { %v649_v32 = vpop.f32.mrf.mxu0 }
 0x238   : > { %v653_v33 = vmul.f32 %v648_v13, %v648_v13  ;;  %v654_v57 = vsel %vm473_vm11, %v652_v31, 0.0 }
 0x239   : > { %v650_v43 = vpop.f32.mrf.mxu0 }
 0x23a   : > { %v655_v34 = vsel %vm473_vm11, %v653_v33, 0.0 }
 0x23b   : > { %v656_v35 = vadd.f32 %v655_v34, %v654_v57 }
 0x23d   : > { %657 = vadd.xlane.f32.xlu0 %v656_v35 }
 0x2c6   : > { %v658_v39 = vpop.xlane.xlu0 %657 }
 0x2c7   : > { %1040 = vrsqrt.f32 %v658_v39  ;;  %vm661_vm14 = vcmp.eq.f32.partialorder %v658_v39, inf  ;;  %v664_v18 = vand.u32 2147483648, %v658_v39  ;;  %vm663_vm15 = vcmp.eq.f32.partialorder %v658_v39, 0.0 }
 0x2d4   : > { %v1041_v42 = vpop.eup %1040 }
 0x2d5   : > { %v660_v36 = vmul.f32 %v1041_v42, %v658_v39 }
 0x2d7   : > { %v662_v40 = vsel %vm661_vm14, %v658_v39, %v660_v36 }
 0x2d8   : > { %v665_v7 = vsel %vm663_vm15, %v664_v18, %v662_v40 }
 0x2d9   : > { %v666_v50 = vadd.f32 1e-06, %v665_v7 }
 0x2db   : > { %1042 = vrcp.f32 %v666_v50 }
 0x2e8   : > { %v1043_v51 = vpop.eup %1042 }
 0x2e9   : > { %v668_v19 = vmul.f32 %v1043_v51, %v646_v30  ;;  %v669_v41 = vmul.f32 %v1043_v51, %v648_v13 }
 0x2eb   : > { %v672_v44 = vcombine.low %v668_v19, %v669_v41 }
 0x2ed   : > { %796 = vst.sshfl [vmem:[#allocation8] sm:$0x33 pattern:$0x76325410] %v672_v44 }
 0x2ee PF: > { %p1380_p10 = scmp.eq.s32.totalorder %s766_s18, 1  ;;  %s1165_s24 = smov [#allocation8]  }
 0x2ef   : > { %s692_s26 = sshll.u32 %s1165_s24, 4  ;;  %s693_s26 = int_to_ptr.vmem [resolvable:$true] %s692_s26 }
 0x2f0   : > { %s1070_s7 = scalar_lea.vmem %s693_s26, 64  ;;  %p1077_p0 = scmp.lt.s32.totalorder %s693_s26, %s693_s26 }
 0x2f1   : > { %p1071_p11 = scmp.ne.s32.totalorder %s693_s26, %s1070_s7  ;;  %p1078_p1 = scmp.lt.s32.totalorder %s1070_s7, %s1070_s7 }
 0x2f3   : > { %p1072_p12 = pnand %p1071_p11, %p1380_p10  ;;  %p1079_p2 = por %p1078_p1, %p1077_p0 }
 0x2f5   : > { %p1073_p13 = pneg %p1072_p12 }
 0x2f7   : > { %p1080_p4 = pnand %p1079_p2, %p1073_p13 }
 0x2f9   : > { %1083 = shalt.err (!%p1080_p4)
}
 0x2fa   : > { %931 = dma.vmem_to_hbm [thread:$0]  (%p1380_p10), %s693_s26, 64, %s1416_s3, [#allocation5]  }
 0x2fb   : > { %1127 = dma.done.wait (%p1380_p10), [#allocation5], 64  }
 0x2fc   : > { %1129 = vsyncadd (%p1380_p10), [#allocation5], 4294967232 }
 0x2fd PF: > { %s18_s17 = sadd.s32 1, %s1152_s17   ;;  %s1424_s12 = smov %s1136_s13 }
 0x2fe   : > { %p15_p6 = scmp.ge.s32.totalorder %s18_s17, 4   ;;  %s1425_s13 = smov %s1140_s14 }
 0x2ff   : > { %s1426_s14 = smov %s1244_s25  ;;  %s1427_s15 = smov %s1148_s16 }
 0x300   : > { %s1428_s16 = smov %s1430_s19  ;;  %17 = sbr.rel (!%p15_p6) target bundleno = 6 (0x6), region = 87 }
 0x305   :  { %705 = vsyncpa [#allocation4], 1 }
 0x306   :  { %707 = vsyncpa [#allocation4 + $0x1], 1 }
 0x307   :  { %708 = vsyncpa [#allocation7], 1 }
 0x308   :  { %709 = vsyncpa [#allocation5], 1 }
 0x309   :  { %711 = vsyncpa [#allocation5 + $0x1], 1 }

</bundles_post_ra>
